<compile_context>
chip_gen: v7x
topology: tpu7x:2x2x1
jax: 0.10.0
libtpu: 0.0.40
codegen_flags: <defaults>
</compile_context>

<pallas_src>
import math

import jax
import jax.numpy as jnp
from jax.experimental import pallas as pl
from jax.experimental.pallas import tpu as pltpu

EPS = 1e-5
VMEM_LIMIT_BYTES = 48 * 1024 * 1024     # v7x-safe; v5e/v6e have 128 MiB physical
BLOCK_BUDGET_BYTES = 24 * 1024 * 1024   # budget for double-buffered blocks + temps


def _largest_divisor_leq(n, cap):
    cap = max(1, min(n, cap))
    for d in range(cap, 0, -1):
        if n % d == 0:
            return d
    return 1


def block_forward(x_nchw, weight, gamma, beta):
    """Forward of Block(down=True, act='relu', use_dropout=False).

    x_nchw: (N, C_in, H, W) f32; weight: (C_out, C_in, 4, 4) f32 (PyTorch OIHW);
    gamma, beta: (C_out,) f32.  Returns (N, C_out, H//2, W//2) f32.
    Note: MXU operands are bf16 (f32 accumulation) -> ~1e-2-level deviation
    from an exact f32 reference is expected.
    """
    n, c_in, h, w = x_nchw.shape
    c_out = weight.shape[0]
    assert h % 2 == 0 and w % 2 == 0, "k=4,s=2,p=1 expects even spatial dims"
    h_out, w_out = h // 2, w // 2
    assert w_out % 8 == 0, "kernel assumes W//2 is a multiple of 8 (sublane)"
    hw = h_out * w_out
    m_total = n * hw
    k_dim = 8 * c_in                       # contraction dim after folding (dw, p, q, c)

    # ------------------------------------------------------------------
    # XLA glue (cheap, ~1x input bytes, no 4x im2col duplication):
    # reflect pad + space-to-depth + kw-fold.
    #   v[b, i*w_out + j, dw*4C + p*2C + q*C + c] = x_pad[b, c, 2i + p, 2(j + dw) + q]
    # so  conv_out[b, i*w_out + j, :] = sum_dh v[b, (i+dh)*w_out + j, :] @ W_fold[dh]
    # ------------------------------------------------------------------
    x_pad = jnp.pad(x_nchw, ((0, 0), (0, 0), (1, 1), (1, 1)), mode="reflect")
    x6 = x_pad.reshape(n, c_in, h_out + 1, 2, w_out + 1, 2)      # (b, c, i, p, jj, q)
    z = jnp.transpose(x6, (0, 2, 4, 3, 5, 1))                    # (b, i, jj, p, q, c)
    z = z.reshape(n, h_out + 1, w_out + 1, 4 * c_in)             # ch = p*2C + q*C + c
    v = jnp.concatenate([z[:, :, :w_out, :], z[:, :, 1:w_out + 1, :]], axis=-1)
    v = v.reshape(n, (h_out + 1) * w_out, k_dim).astype(jnp.bfloat16)
    # TODO(synk): fuse pad + space-to-depth into pass 1 with manual DMA
    # (memory_space=pl.ANY) to also drop this remaining 1x-input rearrangement.

    # Weight: (C_out, C_in, 4, 4) -> W_fold[dh] (8*C_in, C_out), row order (dw,p,q,c).
    w6 = weight.reshape(c_out, c_in, 2, 2, 2, 2)                 # (o, c, dh, p, dw, q)
    w_fold = jnp.transpose(w6, (2, 4, 3, 5, 1, 0)).reshape(2, k_dim, c_out)
    w_fold = w_fold.astype(jnp.bfloat16)

    # ------------------------------------------------------------------
    # Pass-1 tiling: tm = d * w_out rows with d | h_out, sized from a VMEM
    # budget (double-buffered bf16 main/y blocks + f32 temporaries + weights).
    # ------------------------------------------------------------------
    bytes_per_row = 2 * (k_dim * 2) + 2 * (c_out * 2) + 12 * c_out
    fixed_bytes = 2 * (w_out * k_dim * 2) + 2 * (2 * k_dim * c_out * 2)
    max_rows = max(w_out, (BLOCK_BUDGET_BYTES - fixed_bytes) // bytes_per_row)
    d = _largest_divisor_leq(h_out, max_rows // w_out)
    if n * (h_out // d) < 2 and h_out > 1:
        # v7x megacore: make sure the "parallel" grid has >= 2 steps.
        d = _largest_divisor_leq(h_out, max(1, h_out // 2))
    tm = d * w_out
    n_t = h_out // d                                             # tiles per image

    # ------------------------------------------------------------------
    # Pass 1: conv-as-matmul (MXU) + per-tile partial BatchNorm statistics.
    # ------------------------------------------------------------------
    def conv_stats_kernel(v_main_ref, v_bound_ref, w_ref, y_ref, sum_ref, sq_ref):
        # v_main_ref : (1, tm, k_dim) bf16   -> folded-input rows [s0, s0+tm)
        # v_bound_ref: (1, w_out, k_dim) bf16 -> rows [s0+tm, s0+tm+w_out) (kh shift)
        # w_ref      : (2, k_dim, c_out) bf16
        main = v_main_ref[0]
        w1 = w_ref[1]
        y = jnp.dot(main, w_ref[0], preferred_element_type=jnp.float32)
        lo = jnp.dot(v_bound_ref[0], w1, preferred_element_type=jnp.float32)
        if tm > w_out:
            hi = jnp.dot(v_main_ref[0, pl.ds(w_out, tm - w_out), :], w1,
                         preferred_element_type=jnp.float32)
            y = y + jnp.concatenate([hi, lo], axis=0)
        else:
            y = y + lo
        # Partial BN stats from the f32 accumulator (before the bf16 cast).
        sum_ref[...] = jnp.sum(y, axis=0, keepdims=True)[None]
        sq_ref[...] = jnp.sum(y * y, axis=0, keepdims=True)[None]
        # For c_out >= 128 this store is already lane-dense; folding rows into
        # lanes for small c_out would need a sublane->lane relayout in-kernel,
        # so small-c_out layers keep a masked store here (perf note only).
        y_ref[...] = y[None].astype(jnp.bfloat16)

    compiler_params1 = pltpu.CompilerParams(
        dimension_semantics=("parallel", "parallel"),
        vmem_limit_bytes=VMEM_LIMIT_BYTES,
    )
    y_p1, part_sum, part_sq = pl.pallas_call(
        conv_stats_kernel,
        out_shape=(
            jax.ShapeDtypeStruct((n, hw, c_out), jnp.bfloat16),
            jax.ShapeDtypeStruct((n * n_t, 1, c_out), jnp.float32),
            jax.ShapeDtypeStruct((n * n_t, 1, c_out), jnp.float32),
        ),
        grid=(n, n_t),
        in_specs=[
            pl.BlockSpec((1, tm, k_dim), lambda b, t: (b, t, 0)),
            pl.BlockSpec((1, w_out, k_dim), lambda b, t: (b, (t + 1) * d, 0)),
            pl.BlockSpec((2, k_dim, c_out), lambda b, t: (0, 0, 0)),
        ],
        out_specs=(
            pl.BlockSpec((1, tm, c_out), lambda b, t: (b, t, 0)),
            pl.BlockSpec((1, 1, c_out), lambda b, t: (b * n_t + t, 0, 0)),
            pl.BlockSpec((1, 1, c_out), lambda b, t: (b * n_t + t, 0, 0)),
        ),
        compiler_params=compiler_params1,
        cost_estimate=pl.CostEstimate(
            flops=2 * m_total * (16 * c_in) * c_out,
            transcendentals=0,
            bytes_accessed=(v.size * 2 + w_fold.size * 2
                            + m_total * c_out * 2 + 2 * n * n_t * c_out * 4),
        ),
    )(v, v, w_fold)

    # ---- tiny per-channel reduction + BatchNorm affine fold (plain JAX) ----
    total_sum = jnp.sum(part_sum[:, 0, :], axis=0)               # (C_out,)
    total_sq = jnp.sum(part_sq[:, 0, :], axis=0)                 # (C_out,)
    mean = total_sum / m_total
    # NOTE: E[y^2]-E[y]^2 in f32; fine for typical activations, can cancel for
    # |mean| >> std (a centered second pass would be the robust alternative).
    var = jnp.maximum(total_sq / m_total - mean * mean, 0.0)     # biased variance
    inv_std = jax.lax.rsqrt(var + EPS)
    scale = gamma.astype(jnp.float32) * inv_std
    shift = beta.astype(jnp.float32) - mean * scale

    # ------------------------------------------------------------------
    # Pass 2: lane-dense fused scale/shift + ReLU on the bf16 conv output.
    # ------------------------------------------------------------------
    fold = 128 // math.gcd(c_out, 128)
    if m_total % fold != 0:
        fold = 1                                                 # correctness fallback
    lane_w = fold * c_out
    rows = m_total // fold

    row_budget = max(8, BLOCK_BUDGET_BYTES // (lane_w * 12))
    row_tile = rows if rows <= row_budget else (row_budget // 8) * 8
    grid2 = (pl.cdiv(rows, row_tile),)

    y2 = y_p1.reshape(rows, lane_w)                              # free row-major reshape
    scale_row = jnp.tile(scale, fold).reshape(1, lane_w)
    shift_row = jnp.tile(shift, fold).reshape(1, lane_w)

    def bn_relu_kernel(y_ref, scale_ref, shift_ref, o_ref):
        o_ref[...] = jnp.maximum(
            y_ref[...].astype(jnp.float32) * scale_ref[...] + shift_ref[...], 0.0)

    out2 = pl.pallas_call(
        bn_relu_kernel,
        out_shape=jax.ShapeDtypeStruct((rows, lane_w), jnp.float32),
        grid=grid2,
        in_specs=[
            pl.BlockSpec((row_tile, lane_w), lambda i: (i, 0)),
            pl.BlockSpec((1, lane_w), lambda i: (0, 0)),
            pl.BlockSpec((1, lane_w), lambda i: (0, 0)),
        ],
        out_specs=pl.BlockSpec((row_tile, lane_w), lambda i: (i, 0)),
        compiler_params=pltpu.CompilerParams(
            dimension_semantics=("parallel",),
            vmem_limit_bytes=VMEM_LIMIT_BYTES,
        ),
        cost_estimate=pl.CostEstimate(
            flops=2 * rows * lane_w,
            transcendentals=0,
            bytes_accessed=rows * lane_w * (2 + 4) + 2 * lane_w * 4,
        ),
    )(y2, scale_row, shift_row)

    out = out2.reshape(n, h_out, w_out, c_out)
    # TODO(synk): emit NCHW directly from pass 2 (needs W//2 % 128 == 0 for a
    # lane-dense store) to drop this final XLA transpose round trip.
    return jnp.transpose(out, (0, 3, 1, 2))


if __name__ == "__main__":
    key = jax.random.PRNGKey(0)
    k_x, k_w = jax.random.split(key)

    N, C_IN, C_OUT, H, W = 2, 4, 8, 16, 16

    x = jax.random.normal(k_x, (N, C_IN, H, W), dtype=jnp.float32)
    weight = 0.1 * jax.random.normal(k_w, (C_OUT, C_IN, 4, 4), dtype=jnp.float32)
    gamma = jnp.ones((C_OUT,), dtype=jnp.float32)   # BatchNorm2d default init
    beta = jnp.zeros((C_OUT,), dtype=jnp.float32)

    # use_dropout=False -> dropout is identity; nothing to apply.
    block_fn = jax.jit(block_forward)
    out = jax.block_until_ready(block_fn(x, weight, gamma, beta))
    assert out.shape == (N, C_OUT, H // 2, W // 2), out.shape
    assert bool(jnp.isfinite(out).all()) and bool(jnp.all(out >= 0.0))

    # Pure-JAX f32 reference of the same forward pass (loose tolerance: the
    # kernel uses bf16 MXU operands with f32 accumulation).
    x_pad = jnp.pad(x, ((0, 0), (0, 0), (1, 1), (1, 1)), mode="reflect")
    y_ref = jax.lax.conv_general_dilated(
        x_pad, weight, window_strides=(2, 2), padding="VALID",
        dimension_numbers=("NCHW", "OIHW", "NCHW"))
    mu = y_ref.mean(axis=(0, 2, 3), keepdims=True)
    var = y_ref.var(axis=(0, 2, 3), keepdims=True)               # biased variance
    g = gamma.reshape(1, -1, 1, 1)
    b = beta.reshape(1, -1, 1, 1)
    ref = jnp.maximum((y_ref - mu) * jax.lax.rsqrt(var + EPS) * g + b, 0.0)
    max_err = float(jnp.max(jnp.abs(out - ref)))
    assert max_err < 0.1, f"max abs error vs f32 reference: {max_err}"

    print("KERNEL_OK")
</pallas_src>

<mosaic_0001>
module attributes {stable_mosaic.version = 11 : i64} {
  func.func @conv_stats_kernel(%arg0: i32, %arg1: i32, %arg2: memref<1x64x32xbf16, #tpu.memory_space<vmem>>, %arg3: memref<1x8x32xbf16, #tpu.memory_space<vmem>>, %arg4: memref<2x32x8xbf16, #tpu.memory_space<vmem>>, %arg5: memref<1x64x8xbf16, #tpu.memory_space<vmem>>, %arg6: memref<1x1x8xf32, #tpu.memory_space<vmem>>, %arg7: memref<1x1x8xf32, #tpu.memory_space<vmem>>) attributes {dimension_semantics = [#tpu.dimension_semantics<parallel>, #tpu.dimension_semantics<parallel>], iteration_bounds = array<i64: 2, 1>, scalar_prefetch = 0 : i64, scratch_operands = 0 : i64, tpu.core_type = #tpu.core_type<tc>, window_params = [{transform_indices = @transform_0, window_bounds = array<i64: 1, 64, 32>}, {transform_indices = @transform_1, window_bounds = array<i64: 1, 8, 32>}, {pipeline_mode = #tpu.pipeline_mode<synchronous>, transform_indices = @transform_2, window_bounds = array<i64: 2, 32, 8>}, {transform_indices = @transform_3, window_bounds = array<i64: 1, 64, 8>}, {transform_indices = @transform_4, window_bounds = array<i64: 1, 1, 8>}, {transform_indices = @transform_5, window_bounds = array<i64: 1, 1, 8>}]} {
    %c0 = arith.constant 0 : index
    %c0_0 = arith.constant 0 : index
    %c0_1 = arith.constant 0 : index
    %0 = vector.load %arg2[%c0, %c0_0, %c0_1] : memref<1x64x32xbf16, #tpu.memory_space<vmem>>, vector<1x64x32xbf16>
    %1 = vector.shape_cast %0 : vector<1x64x32xbf16> to vector<64x32xbf16>
    %c1 = arith.constant 1 : index
    %c0_2 = arith.constant 0 : index
    %c0_3 = arith.constant 0 : index
    %2 = vector.load %arg4[%c1, %c0_2, %c0_3] : memref<2x32x8xbf16, #tpu.memory_space<vmem>>, vector<1x32x8xbf16>
    %3 = vector.shape_cast %2 : vector<1x32x8xbf16> to vector<32x8xbf16>
    %c0_4 = arith.constant 0 : index
    %c0_5 = arith.constant 0 : index
    %c0_6 = arith.constant 0 : index
    %4 = vector.load %arg4[%c0_4, %c0_5, %c0_6] : memref<2x32x8xbf16, #tpu.memory_space<vmem>>, vector<1x32x8xbf16>
    %5 = vector.shape_cast %4 : vector<1x32x8xbf16> to vector<32x8xbf16>
    %cst = arith.constant dense<0.000000e+00> : vector<64x8xf32>
    %6 = tpu.matmul %1, %5, %cst {dimension_numbers = #tpu.dot_dimension_numbers<[1], [0], [0], [1], [0, 0, 1, 1], [], []>} : vector<64x32xbf16>, vector<32x8xbf16>, vector<64x8xf32> -> vector<64x8xf32>
    %c0_7 = arith.constant 0 : index
    %c0_8 = arith.constant 0 : index
    %c0_9 = arith.constant 0 : index
    %7 = vector.load %arg3[%c0_7, %c0_8, %c0_9] : memref<1x8x32xbf16, #tpu.memory_space<vmem>>, vector<1x8x32xbf16>
    %8 = vector.shape_cast %7 : vector<1x8x32xbf16> to vector<8x32xbf16>
    %cst_10 = arith.constant dense<0.000000e+00> : vector<8x8xf32>
    %9 = tpu.matmul %8, %3, %cst_10 {dimension_numbers = #tpu.dot_dimension_numbers<[1], [0], [0], [1], [0, 0, 1, 1], [], []>} : vector<8x32xbf16>, vector<32x8xbf16>, vector<8x8xf32> -> vector<8x8xf32>
    %c0_11 = arith.constant 0 : index
    %c8 = arith.constant 8 : index
    %c0_12 = arith.constant 0 : index
    %10 = vector.load %arg2[%c0_11, %c8, %c0_12] : memref<1x64x32xbf16, #tpu.memory_space<vmem>>, vector<1x56x32xbf16>
    %11 = vector.shape_cast %10 : vector<1x56x32xbf16> to vector<56x32xbf16>
    %cst_13 = arith.constant dense<0.000000e+00> : vector<56x8xf32>
    %12 = tpu.matmul %11, %3, %cst_13 {dimension_numbers = #tpu.dot_dimension_numbers<[1], [0], [0], [1], [0, 0, 1, 1], [], []>} : vector<56x32xbf16>, vector<32x8xbf16>, vector<56x8xf32> -> vector<56x8xf32>
    %13 = tpu.concatenate %12, %9 in 0 : vector<56x8xf32>, vector<8x8xf32> -> vector<64x8xf32>
    %14 = arith.addf %6, %13 : vector<64x8xf32>
    %cst_14 = arith.constant dense<0.000000e+00> : vector<8xf32>
    %15 = vector.multi_reduction <add>, %14, %cst_14 [0] : vector<64x8xf32> to vector<8xf32>
    %16 = vector.shape_cast %15 : vector<8xf32> to vector<1x8xf32>
    %17 = vector.shape_cast %16 : vector<1x8xf32> to vector<1x1x8xf32>
    %c0_15 = arith.constant 0 : index
    %c0_16 = arith.constant 0 : index
    %c0_17 = arith.constant 0 : index
    %18 = vector.load %arg6[%c0_15, %c0_16, %c0_17] : memref<1x1x8xf32, #tpu.memory_space<vmem>>, vector<1x1x8xf32>
    tpu.vector_store %arg6[%c0_15, %c0_16, %c0_17], %17 {strides = array<i32>} : memref<1x1x8xf32, #tpu.memory_space<vmem>>, vector<1x1x8xf32>,
    %19 = arith.mulf %14, %14 : vector<64x8xf32>
    %cst_18 = arith.constant dense<0.000000e+00> : vector<8xf32>
    %20 = vector.multi_reduction <add>, %19, %cst_18 [0] : vector<64x8xf32> to vector<8xf32>
    %21 = vector.shape_cast %20 : vector<8xf32> to vector<1x8xf32>
    %22 = vector.shape_cast %21 : vector<1x8xf32> to vector<1x1x8xf32>
    %c0_19 = arith.constant 0 : index
    %c0_20 = arith.constant 0 : index
    %c0_21 = arith.constant 0 : index
    %23 = vector.load %arg7[%c0_19, %c0_20, %c0_21] : memref<1x1x8xf32, #tpu.memory_space<vmem>>, vector<1x1x8xf32>
    tpu.vector_store %arg7[%c0_19, %c0_20, %c0_21], %22 {strides = array<i32>} : memref<1x1x8xf32, #tpu.memory_space<vmem>>, vector<1x1x8xf32>,
    %24 = vector.shape_cast %14 : vector<64x8xf32> to vector<1x64x8xf32>
    %25 = arith.truncf %24 : vector<1x64x8xf32> to vector<1x64x8xbf16>
    %c0_22 = arith.constant 0 : index
    %c0_23 = arith.constant 0 : index
    %c0_24 = arith.constant 0 : index
    %26 = vector.load %arg5[%c0_22, %c0_23, %c0_24] : memref<1x64x8xbf16, #tpu.memory_space<vmem>>, vector<1x64x8xbf16>
    tpu.vector_store %arg5[%c0_22, %c0_23, %c0_24], %25 {strides = array<i32>} : memref<1x64x8xbf16, #tpu.memory_space<vmem>>, vector<1x64x8xbf16>,
    return
  }
  func.func @transform_0(%arg0: i32, %arg1: i32) -> (i32, i32, i32) {
    %c0_i32 = arith.constant 0 : i32
    %c0_i32_0 = arith.constant 0 : i32
    return %arg0, %arg1, %c0_i32 : i32, i32, i32
  }
  func.func @transform_1(%arg0: i32, %arg1: i32) -> (i32, i32, i32) {
    %c1_i32 = arith.constant 1 : i32
    %0 = arith.addi %arg1, %c1_i32 : i32
    %c8_i32 = arith.constant 8 : i32
    %1 = arith.muli %0, %c8_i32 : i32
    %c0_i32 = arith.constant 0 : i32
    %c0_i32_0 = arith.constant 0 : i32
    return %arg0, %1, %c0_i32 : i32, i32, i32
  }
  func.func @transform_2(%arg0: i32, %arg1: i32) -> (i32, i32, i32) {
    %c0_i32 = arith.constant 0 : i32
    %c0_i32_0 = arith.constant 0 : i32
    %c0_i32_1 = arith.constant 0 : i32
    %c0_i32_2 = arith.constant 0 : i32
    return %c0_i32, %c0_i32_0, %c0_i32_1 : i32, i32, i32
  }
  func.func @transform_3(%arg0: i32, %arg1: i32) -> (i32, i32, i32) {
    %c0_i32 = arith.constant 0 : i32
    %c0_i32_0 = arith.constant 0 : i32
    return %arg0, %arg1, %c0_i32 : i32, i32, i32
  }
  func.func @transform_4(%arg0: i32, %arg1: i32) -> (i32, i32, i32) {
    %c1_i32 = arith.constant 1 : i32
    %0 = arith.muli %arg0, %c1_i32 : i32
    %1 = arith.addi %0, %arg1 : i32
    %c0_i32 = arith.constant 0 : i32
    %c0_i32_0 = arith.constant 0 : i32
    %c0_i32_1 = arith.constant 0 : i32
    return %1, %c0_i32, %c0_i32_0 : i32, i32, i32
  }
  func.func @transform_5(%arg0: i32, %arg1: i32) -> (i32, i32, i32) {
    %c1_i32 = arith.constant 1 : i32
    %0 = arith.muli %arg0, %c1_i32 : i32
    %1 = arith.addi %0, %arg1 : i32
    %c0_i32 = arith.constant 0 : i32
    %c0_i32_0 = arith.constant 0 : i32
    %c0_i32_1 = arith.constant 0 : i32
    return %1, %c0_i32, %c0_i32_0 : i32, i32, i32
  }
}

module attributes {stable_mosaic.version = 11 : i64} {
  func.func @bn_relu_kernel(%arg0: i32, %arg1: memref<8x128xbf16, #tpu.memory_space<vmem>>, %arg2: memref<1x128xf32, #tpu.memory_space<vmem>>, %arg3: memref<1x128xf32, #tpu.memory_space<vmem>>, %arg4: memref<8x128xf32, #tpu.memory_space<vmem>>) attributes {dimension_semantics = [#tpu.dimension_semantics<parallel>], iteration_bounds = array<i64: 1>, scalar_prefetch = 0 : i64, scratch_operands = 0 : i64, tpu.core_type = #tpu.core_type<tc>, window_params = [{transform_indices = @transform_0, window_bounds = array<i64: 8, 128>}, {pipeline_mode = #tpu.pipeline_mode<synchronous>, transform_indices = @transform_1, window_bounds = array<i64: 1, 128>}, {pipeline_mode = #tpu.pipeline_mode<synchronous>, transform_indices = @transform_2, window_bounds = array<i64: 1, 128>}, {transform_indices = @transform_3, window_bounds = array<i64: 8, 128>}]} {
    %c0 = arith.constant 0 : index
    %c0_0 = arith.constant 0 : index
    %0 = vector.load %arg1[%c0, %c0_0] : memref<8x128xbf16, #tpu.memory_space<vmem>>, vector<8x128xbf16>
    %1 = arith.extf %0 : vector<8x128xbf16> to vector<8x128xf32>
    %c0_1 = arith.constant 0 : index
    %c0_2 = arith.constant 0 : index
    %2 = vector.load %arg2[%c0_1, %c0_2] : memref<1x128xf32, #tpu.memory_space<vmem>>, vector<1x128xf32>
    %3 = vector.broadcast %2 : vector<1x128xf32> to vector<8x128xf32>
    %4 = arith.mulf %1, %3 : vector<8x128xf32>
    %c0_3 = arith.constant 0 : index
    %c0_4 = arith.constant 0 : index
    %5 = vector.load %arg3[%c0_3, %c0_4] : memref<1x128xf32, #tpu.memory_space<vmem>>, vector<1x128xf32>
    %6 = vector.broadcast %5 : vector<1x128xf32> to vector<8x128xf32>
    %7 = arith.addf %4, %6 : vector<8x128xf32>
    %cst = arith.constant 0.000000e+00 : f32
    %8 = vector.broadcast %cst : f32 to vector<8x128xf32>
    %9 = arith.maximumf %7, %8 : vector<8x128xf32>
    %c0_5 = arith.constant 0 : index
    %c0_6 = arith.constant 0 : index
    %10 = vector.load %arg4[%c0_5, %c0_6] : memref<8x128xf32, #tpu.memory_space<vmem>>, vector<8x128xf32>
    tpu.vector_store %arg4[%c0_5, %c0_6], %9 {strides = array<i32>} : memref<8x128xf32, #tpu.memory_space<vmem>>, vector<8x128xf32>,
    return
  }
  func.func @transform_0(%arg0: i32) -> (i32, i32) {
    %c0_i32 = arith.constant 0 : i32
    %c0_i32_0 = arith.constant 0 : i32
    return %arg0, %c0_i32 : i32, i32
  }
  func.func @transform_1(%arg0: i32) -> (i32, i32) {
    %c0_i32 = arith.constant 0 : i32
    %c0_i32_0 = arith.constant 0 : i32
    %c0_i32_1 = arith.constant 0 : i32
    return %c0_i32, %c0_i32_0 : i32, i32
  }
  func.func @transform_2(%arg0: i32) -> (i32, i32) {
    %c0_i32 = arith.constant 0 : i32
    %c0_i32_0 = arith.constant 0 : i32
    %c0_i32_1 = arith.constant 0 : i32
    return %c0_i32, %c0_i32_0 : i32, i32
  }
  func.func @transform_3(%arg0: i32) -> (i32, i32) {
    %c0_i32 = arith.constant 0 : i32
    %c0_i32_0 = arith.constant 0 : i32
    return %arg0, %c0_i32 : i32, i32
  }
}

</mosaic_0001>

<bundles_post_ra>
// kernel: tile.13
= control target key start
LH: loop header
LB: loop body
LE: loop exit
PB: predicated region body
PF: predicated region fallthrough
CT: control target
= control target key end

     0   :  { %s28_s0 = inlined_call_operand.vmem [shape: f32[8], index: 0, kind: input, shape index: {}]   ;;  %s29_s1 = inlined_call_operand.vmem [shape: f32[16,8], index: 1, kind: output, shape index: {}]  }
   0x1   :  { %v4_v0 = vld [vmem:[%s28_s0] ss:$0 sm:$0xff] }
   0x2   :  { %5 = vst [vmem:[%s29_s1] sm:$0xff] %v4_v0  ;;  %8 = vst [vmem:[%s29_s1 + $0x8] sm:$0xff] %v4_v0 }

// kernel: tile.14
= control target key start
LH: loop header
LB: loop body
LE: loop exit
PB: predicated region body
PF: predicated region fallthrough
CT: control target
= control target key end

     0   :  { %s131_s10 = smov 120   ;;  %s132_s11 = smov 104   ;;  %vm3_vm0 = vcmask 64512   ;;  %vm9_vm1 = vcmask 1048512   ;;  %vm15_vm2 = vcmask 982912   ;;  %vm21_vm3 = vcmask 917312   ;;  %s207_s0 = inlined_call_operand.vmem [shape: f32[16,8], index: 0, kind: input, shape index: {}]   ;;  %s208_s1 = inlined_call_operand.vmem [shape: f32[1,128], index: 1, kind: output, shape index: {}]  }
   0x1   :  { %v101_v0 = vld [vmem:[%s207_s0 + $0xf] sm:$0x1]   ;;  %v103_v1 = vld [vmem:[%s207_s0 + $0xd] sm:$0x1]   ;;  %v102_v2 = vld [vmem:[%s207_s0 + $0xe] sm:$0x1]  }
   0x2   :  { %7 = vrot.lane.b32.xlu0 %v101_v0, %s131_s10  ;;  %19 = vrot.lane.b32.xlu1 %v103_v1, %s132_s11  ;;  %v104_v3 = vld [vmem:[%s207_s0 + $0xc] sm:$0x1]   ;;  %s133_s16 = smov 112   ;;  %s134_s17 = smov 96   ;;  %v105_v4 = vld [vmem:[%s207_s0 + $0xb] sm:$0x1]  }
   0x3   :  { %v106_v5 = vld [vmem:[%s207_s0 + $0xa] sm:$0x1]   ;;  %v2_v6 = vld [vmem:[%s207_s0] sm:$0x1]   ;;  %s135_s24 = smov 88   ;;  %s136_s25 = smov 80  }
   0x4   :  { %4 = vst.msk [vmem:[#allocation0] sm:$0x1] %vm3_vm0, %v2_v6   ;;  %v107_v7 = vld [vmem:[%s207_s0 + $0x9] sm:$0x1]   ;;  %v108_v8 = vld [vmem:[%s207_s0 + $0x8] sm:$0x1]  }
   0x5   :  { %s137_s30 = smov 72   ;;  %s138_s2 = smov 64   ;;  %v109_v9 = vld [vmem:[%s207_s0 + $0x7] sm:$0x1]   ;;  %v110_v10 = vld [vmem:[%s207_s0 + $0x6] sm:$0x1]  }
   0x6   :  { %13 = vrot.lane.b32.xlu0 %v102_v2, %s133_s16  ;;  %25 = vrot.lane.b32.xlu1 %v104_v3, %s134_s17  ;;  %s139_s7 = smov 56   ;;  %s140_s8 = smov 48   ;;  %v111_v11 = vld [vmem:[%s207_s0 + $0x5] sm:$0x1]   ;;  %v112_v12 = vld [vmem:[%s207_s0 + $0x4] sm:$0x1]  }
   0x7   :  { %s141_s13 = smov 40   ;;  %s142_s14 = smov 32   ;;  %v113_v13 = vld [vmem:[%s207_s0 + $0x3] sm:$0x1]   ;;  %v114_v14 = vld [vmem:[%s207_s0 + $0x2] sm:$0x1]  }
   0x8   :  { %s143_s19 = smov 24   ;;  %s144_s20 = smov 16   ;;  %v115_v15 = vld [vmem:[%s207_s0 + $0x1] sm:$0x1]   ;;  %vm27_vm4 = vcmask 851712   ;;  %vm33_vm5 = vcmask 786112  }
   0x9   :  { %s145_s0 = smov 8   ;;  %vm39_vm6 = vcmask 720512   ;;  %vm45_vm7 = vcmask 654912   ;;  %vm51_vm8 = vcmask 589312   ;;  %vm57_vm9 = vcmask 523712  }
   0xa   :  { %31 = vrot.lane.b32.xlu0 %v105_v4, %s135_s24  ;;  %37 = vrot.lane.b32.xlu1 %v106_v5, %s136_s25  ;;  %vm63_vm10 = vcmask 458112   ;;  %vm69_vm11 = vcmask 392512   ;;  %vm75_vm12 = vcmask 326912   ;;  %vm81_vm13 = vcmask 261312  }
   0xb   :  { %vm87_vm14 = vcmask 195712   ;;  %vm93_vm15 = vcmask 130112  }
   0xe   :  { %43 = vrot.lane.b32.xlu0 %v107_v7, %s137_s30  ;;  %49 = vrot.lane.b32.xlu1 %v108_v8, %s138_s2 }
  0x12   :  { %55 = vrot.lane.b32.xlu0 %v109_v9, %s139_s7  ;;  %61 = vrot.lane.b32.xlu1 %v110_v10, %s140_s8 }
  0x16   :  { %67 = vrot.lane.b32.xlu0 %v111_v11, %s141_s13  ;;  %73 = vrot.lane.b32.xlu1 %v112_v12, %s142_s14 }
  0x1a   :  { %79 = vrot.lane.b32.xlu0 %v113_v13, %s143_s19  ;;  %85 = vrot.lane.b32.xlu1 %v114_v14, %s144_s20 }
  0x1e   :  { %91 = vrot.lane.b32.xlu0 %v115_v15, %s145_s0 }
  0x74   :  { %v8_v16 = vpop.permute.xlu0 %7   ;;  %v20_v17 = vpop.permute.xlu1 %19  }
  0x75   :  { %10 = vst.msk [vmem:[#allocation0] sm:$0x1] %vm9_vm1, %v8_v16  }
  0x78   :  { %v14_v18 = vpop.permute.xlu0 %13   ;;  %v26_v19 = vpop.permute.xlu1 %25  }
  0x79   :  { %16 = vst.msk [vmem:[#allocation0] sm:$0x1] %vm15_vm2, %v14_v18  }
  0x7a   :  { %22 = vst.msk [vmem:[#allocation0] sm:$0x1] %vm21_vm3, %v20_v17  }
  0x7b   :  { %28 = vst.msk [vmem:[#allocation0] sm:$0x1] %vm27_vm4, %v26_v19  }
  0x7c   :  { %v32_v20 = vpop.permute.xlu0 %31   ;;  %v38_v21 = vpop.permute.xlu1 %37  }
  0x7d   :  { %34 = vst.msk [vmem:[#allocation0] sm:$0x1] %vm33_vm5, %v32_v20  }
  0x7e   :  { %40 = vst.msk [vmem:[#allocation0] sm:$0x1] %vm39_vm6, %v38_v21  }
  0x80   :  { %v44_v22 = vpop.permute.xlu0 %43   ;;  %v50_v23 = vpop.permute.xlu1 %49  }
  0x81   :  { %46 = vst.msk [vmem:[#allocation0] sm:$0x1] %vm45_vm7, %v44_v22  }
  0x82   :  { %52 = vst.msk [vmem:[#allocation0] sm:$0x1] %vm51_vm8, %v50_v23  }
  0x84   :  { %v56_v24 = vpop.permute.xlu0 %55   ;;  %v62_v25 = vpop.permute.xlu1 %61  }
  0x85   :  { %58 = vst.msk [vmem:[#allocation0] sm:$0x1] %vm57_vm9, %v56_v24  }
  0x86   :  { %64 = vst.msk [vmem:[#allocation0] sm:$0x1] %vm63_vm10, %v62_v25  }
  0x88   :  { %v68_v26 = vpop.permute.xlu0 %67   ;;  %v74_v27 = vpop.permute.xlu1 %73  }
  0x89   :  { %70 = vst.msk [vmem:[#allocation0] sm:$0x1] %vm69_vm11, %v68_v26  }
  0x8a   :  { %76 = vst.msk [vmem:[#allocation0] sm:$0x1] %vm75_vm12, %v74_v27  }
  0x8c   :  { %v80_v28 = vpop.permute.xlu0 %79   ;;  %v86_v29 = vpop.permute.xlu1 %85  }
  0x8d   :  { %82 = vst.msk [vmem:[#allocation0] sm:$0x1] %vm81_vm13, %v80_v28  }
  0x8e   :  { %88 = vst.msk [vmem:[#allocation0] sm:$0x1] %vm87_vm14, %v86_v29  }
  0x90   :  { %v92_v30 = vpop.permute.xlu0 %91  }
  0x91   :  { %94 = vst.msk [vmem:[#allocation0] sm:$0x1] %vm93_vm15, %v92_v30  }
  0x98   :  { %v98_v31 = vld [vmem:[#allocation0] sm:$0x1] }
  0x99   :  { %100 = vst [vmem:[%s208_s1] sm:$0x1] %v98_v31 }

// kernel: block_forward.3
= control target key start
LH: loop header
LB: loop body
LE: loop exit
PB: predicated region body
PF: predicated region fallthrough
CT: control target
= control target key end

     0   :  { %s72_s0 = inlined_call_operand.vmem [shape: bf16[8,128], index: 0, kind: input, shape index: {}]   ;;  %s73_s1 = inlined_call_operand.vmem [shape: f32[1,128], index: 1, kind: input, shape index: {}]   ;;  %s74_s2 = inlined_call_operand.vmem [shape: f32[1,128], index: 2, kind: input, shape index: {}]   ;;  %s75_s3 = inlined_call_operand.vmem [shape: f32[8,128], index: 3, kind: output, shape index: {}]  }
   0x1   :  { %v14_v0 = vld [vmem:[%s72_s0] sm:$0xf] }
   0x2   :  { %v38_v1 = vld [vmem:[%s73_s1] ss:$0 sm:$0xff]  ;;  %v15_v2 = vunpack.c.l.bf16 %v14_v0 }
   0x3   :  { %v39_v3 = vld [vmem:[%s74_s2] ss:$0 sm:$0xff] }
   0x4   :  { %v23_v4 = vmul.f32 %v38_v1, %v15_v2 }
   0x6   :  { %v31_v5 = vadd.f32 %v39_v3, %v23_v4 }
   0x8   :  { %v32_v6 = vmax.f32 %v31_v5, 0.0 }
   0xa   :  { %33 = vst [vmem:[%s75_s3] sm:$0xff] %v32_v6 }

// kernel: block_forward.2
= control target key start
LH: loop header
LB: loop body
LE: loop exit
PB: predicated region body
PF: predicated region fallthrough
CT: control target
= control target key end

     0   :  { %s1079_s18 = smov 0   ;;  %s1081_s19 = smov 0   ;;  %s1182_s0 = inlined_call_operand.vmem [shape: bf16[2,72,32], index: 0, kind: input, shape index: {}, may-alias: {0,1}]   ;;  %s1183_s1 = inlined_call_operand.vmem [shape: bf16[2,72,32], index: 1, kind: input, shape index: {}, may-alias: {0,1}]   ;;  %s1184_s2 = inlined_call_operand.vmem [shape: bf16[2,32,8], index: 2, kind: input, shape index: {}]   ;;  %s1185_s3 = inlined_call_operand.vmem [shape: bf16[2,64,8], index: 3, kind: output, shape index: {0}]   ;;  %s1186_s4 = inlined_call_operand.vmem [shape: f32[2,1,8], index: 4, kind: output, shape index: {1}]   ;;  %s1187_s5 = inlined_call_operand.vmem [shape: f32[2,1,8], index: 5, kind: output, shape index: {2}]  }
   0x1   :  { %s1083_s20 = smov 0  }
   0x2 LB: > { %s28_s21 = sadd.s32 1, %s1041_s19  ;;  %p880_p0 = scmp.ge.s32.totalorder %s1045_s20, 1  ;;  %s1045_s20 = sphi %s1083_s20, %s16_s20   ;;  %s1041_s19 = sphi %s1081_s19, %s1189_s19   ;;  %s1037_s18 = sphi %s1079_s18, %s1188_s18  }
   0x3   : > { %p30_p1 = scmp.ge.s32.totalorder %s28_s21, 2  ;;  %p248_p2 = scmp.lt.s32.totalorder %s1045_s20, 3 }
   0x5   : > { %s1191_s21 = smov (%p30_p1, %s28_s21), 0  ;;  %p249_p3 = pnand %p880_p0, %p248_p2 }
   0x6   : > { %v1011_v0 = vld [vmem:[%s1184_s2 + $0x10] sm:$0xff] (!%p249_p3)   ;;  %v1047_v1 = vmov (!%p249_p3), 0.0   ;;  %v1012_v2 = vld [vmem:[%s1184_s2] sm:$0xff] (!%p249_p3)   ;;  %v1013_v3 = vld [vmem:[%s1184_s2 + $0x18] sm:$0xff] (!%p249_p3)   ;;  %vm1048_vm0 = vmmov (!%p249_p3), 0   ;;  %p311_p4 = scmp.lt.s32.totalorder (!%p249_p3), %s1037_s18, 1 }
   0x7   : > { %252 = sbr.rel (%p249_p3) target bundleno = 275 (0x113), region = 32  ;;  %946 = vmatprep.subr.bf16.mxu0 (!%p249_p3), %v1047_v1  ;;  %950 = vmatprep.mubr.msk.bf16.mxu0 (!%p249_p3), %vm1048_vm0, %v1047_v1  ;;  %v1014_v4 = vld [vmem:[%s1184_s2 + $0x8] sm:$0xff] (!%p249_p3)   ;;  %vm387_vm1 = vcmask (!%p249_p3), 261120   ;;  %vm706_vm2 = vcmask (!%p249_p3), 60416   ;;  %vm620_vm3 = vcmask (!%p249_p3), 64512   ;;  %vm642_vm4 = vcmask (!%p249_p3), 57344  }
   0x8   : > { %947 = vmatpush3.bf16.msra.mxu0 (!%p249_p3), %v1011_v0  ;;  %966 = vmatprep.subr.bf16.mxu1 (!%p249_p3), %v1012_v2 }
   0x9   : > { %948 = vmatprep.subr.bf16.mxu0 (!%p249_p3), %v1047_v1  ;;  %967 = vmatpush3.bf16.msra.mxu1 (!%p249_p3), %v1012_v2 }
   0xa   : > { %968 = vmatprep.subr.bf16.mxu1 (!%p249_p3), %v1014_v4 }
   0xc   : > { %949 = vmatpush3.bf16.msra.mxu0 (!%p249_p3), %v1013_v3 }
   0xd   : > { %954 = vmatprep.subr.bf16.mxu0 (!%p249_p3), %v1011_v0  ;;  %969 = vmatpush3.bf16.msra.mxu1 (!%p249_p3), %v1014_v4 }
   0xe   : > { %s1193_s18 = smov (!%p311_p4, %s1037_s18), 1 }
   0xf   : > { %s982_s30 = smul.u32 36, %s1193_s18  ;;  %s922_s13 = sshll.u32 %s1193_s18, 5 }
  0x10   : > { %s1131_s16 = scalar_lea.vmem %s1185_s3, %s922_s13  ;;  %s349_s23 = scalar_lea.vmem %s1186_s4, %s1193_s18 }
  0x11   : > { %s318_s8 = scalar_lea.vmem %s1182_s0, %s982_s30  ;;  %s921_s9 = sadd.s32 32, %s982_s30 }
  0x12   : > { %s333_s12 = scalar_lea.vmem %s1183_s1, %s921_s9  ;;  %v357_v5 = vld [vmem:[%s318_s8] sm:$0xf]  ;;  %v358_v6 = vld [vmem:[%s318_s8 + $0x4] sm:$0xf]  ;;  %v359_v7 = vld [vmem:[%s318_s8 + $0x8] sm:$0xf]  ;;  %s354_s26 = scalar_lea.vmem %s1187_s5, %s1193_s18 }
  0x13   : > { %v374_v8 = vld [vmem:[%s333_s12] sm:$0xf]  ;;  %v360_v9 = vld [vmem:[%s318_s8 + $0xc] sm:$0xf]  ;;  %v361_v10 = vld [vmem:[%s318_s8 + $0x10] sm:$0xf]  ;;  %v892_v11 = vcombine.low %v358_v6, %v359_v7  ;;  %v900_v12 = vcombine.low %v357_v5, %v358_v6 }
  0x14   : > { %951 = vmatmul.mubr.msk.bf16.vlgmr.msra.gmra.mrb[0].mxu0 %vm387_vm1, %v374_v8  ;;  %v901_v13 = vcombine.low %v359_v7, %v360_v9  ;;  %v362_v14 = vld [vmem:[%s318_s8 + $0x14] sm:$0xf]  ;;  %v363_v16 = vld [vmem:[%s318_s8 + $0x18] sm:$0xf]  ;;  %v364_v17 = vld [vmem:[%s318_s8 + $0x1c] sm:$0xf]  ;;  %v893_v18 = vcombine.low %v360_v9, %v361_v10 }
  0x15   : > { %970 = vmatprep.mubr.msk.bf16.mxu1 %vm387_vm1, %v900_v12  ;;  %955 = vmatpush3.bf16.msra.mxu0 %v1011_v0  ;;  %v902_v15 = vcombine.low %v361_v10, %v362_v14  ;;  %v894_v19 = vcombine.low %v362_v14, %v363_v16  ;;  %v903_v20 = vcombine.low %v363_v16, %v364_v17 }
  0x16   : > { %971 = vmatmul.mubr.msk.bf16.vlgmr.msra.gmra.mrb[0].mxu1 %vm387_vm1, %v901_v13  ;;  %956 = vmatprep.subr.bf16.mxu0 %v1013_v3  ;;  %v895_v21 = vcombine.low %v364_v17, %v364_v17 }
  0x17   : > { %958 = vmatprep.mubr.msk.bf16.mxu0 %vm387_vm1, %v892_v11  ;;  %974 = vmatprep.mubr.msk.bf16.mxu1 %vm387_vm1, %v902_v15 }
  0x19   : > { %957 = vmatpush3.bf16.msra.mxu0 %v1013_v3 }
  0x1c   : > { %959 = vmatmul.mubr.msk.bf16.vlgmr.msra.gmra.mrb[4].mxu0 %vm387_vm1, %v893_v18 }
  0x1d   : > { %962 = vmatprep.mubr.msk.bf16.mxu0 %vm387_vm1, %v894_v19 }
  0x1e   : > { %975 = vmatmul.mubr.msk.bf16.gmra.mrb[4].mxu1 %vm387_vm1, %v903_v20 }
  0x24   : > { %963 = vmatmul.mubr.msk.bf16.gmra.mrb[8].mxu0 %vm387_vm1, %v895_v21 }
  0xe7   : > { %v425_v22 = vpop.f32.mrb[0].mxu0 }
  0xe8   : > { %v952_v23 = vpop.f32.mrb[1].mxu0 }
  0xe9   : > { %v428_v24 = vpop.f32.mrb[2].mxu0  ;;  %v972_v25 = vpop.f32.mrb[0].mxu1 }
  0xea   : > { %v953_v26 = vpop.f32.mrb[3].mxu0  ;;  %v589_v27 = vpop.f32.mrb[1].mxu1 }
  0xeb   : > { %v973_v28 = vpop.f32.mrb[2].mxu1 }
  0xec   : > { %v592_v29 = vpop.f32.mrb[3].mxu1 }
  0xef   : > { %v960_v30 = vpop.f32.mrb[4].mxu0 }
  0xf0   : > { %v598_v31 = vadd.f32 %v972_v25, %v960_v30  ;;  %v495_v32 = vpop.f32.mrb[5].mxu0 }
  0xf1   : > { %v590_v33 = vadd.f32 %v589_v27, %v495_v32  ;;  %v976_v34 = vpop.f32.mrb[4].mxu1  ;;  %v961_v35 = vpop.f32.mrb[6].mxu0 }
  0xf2   : > { %v925_v36 = vpack.c.bf16 %v598_v31, %v598_v31  ;;  %v601_v37 = vadd.f32 %v973_v28, %v961_v35  ;;  %v605_v38 = vpop.f32.mrb[5].mxu1  ;;  %v498_v39 = vpop.f32.mrb[7].mxu0  ;;  %v646_v44 = vmul.f32 %v598_v31, %v598_v31  ;;  %v624_v53 = vsel %vm620_vm3, %v598_v31, 0.0 }
  0xf3   : > { %v644_v40 = vmul.f32 %v590_v33, %v590_v33  ;;  %v923_v41 = vpack.c.bf16 %v590_v33, %v590_v33  ;;  %v593_v42 = vadd.f32 %v592_v29, %v498_v39  ;;  %v977_v43 = vpop.f32.mrb[6].mxu1  ;;  %v621_v47 = vsel %vm620_vm3, %v590_v33, 0.0 }
  0xf4   : > { %709 = vst.msk [vmem:[%s1131_s16 + $0x8] sm:$0xf] %vm706_vm2, %v925_v36  ;;  %v926_v45 = vpack.c.bf16 %v601_v37, %v601_v37  ;;  %v608_v46 = vpop.f32.mrb[7].mxu1  ;;  %v617_v52 = vadd.f32 %v977_v43, %v425_v22  ;;  %v647_v55 = vmul.f32 %v601_v37, %v601_v37  ;;  %v655_v58 = vsel %vm620_vm3, %v646_v44, 0.0 }
  0xf5   : > { %707 = vst.msk [vmem:[%s1131_s16] sm:$0xf] %vm706_vm2, %v923_v41  ;;  %v622_v48 = vsel %vm620_vm3, %v593_v42, 0.0  ;;  %v645_v49 = vmul.f32 %v593_v42, %v593_v42  ;;  %v924_v50 = vpack.c.bf16 %v593_v42, %v593_v42  ;;  %v652_v54 = vsel %vm620_vm3, %v644_v40, 0.0 }
  0xf6   : > { %710 = vst.msk [vmem:[%s1131_s16 + $0xc] sm:$0xf] %vm706_vm2, %v926_v45  ;;  %v623_v51 = vadd.f32 %v622_v48, %v621_v47  ;;  %v626_v62 = vsel %vm620_vm3, %v601_v37, 0.0  ;;  %v930_v63 = vpack.c.bf16 %v617_v52, %v617_v52  ;;  %v657_v6 = vsel %vm620_vm3, %v647_v55, 0.0 }
  0xf7   : > { %v653_v56 = vsel %vm620_vm3, %v645_v49, 0.0  ;;  %708 = vst.msk [vmem:[%s1131_s16 + $0x4] sm:$0xf] %vm706_vm2, %v924_v50  ;;  %v964_v57 = vpop.f32.mrb[8].mxu0  ;;  %v651_v21 = vmul.f32 %v617_v52, %v617_v52  ;;  %v634_v26 = vsel %vm620_vm3, %v617_v52, 0.0 }
  0xf8   : > { %v625_v59 = vadd.f32 %v624_v53, %v623_v51  ;;  %v654_v60 = vadd.f32 %v653_v56, %v652_v54  ;;  %v511_v61 = vpop.f32.mrb[9].mxu0  ;;  %v614_v0 = vadd.f32 %v976_v34, %v964_v57  ;;  %714 = vst.msk [vmem:[%s1131_s16 + $0x1c] sm:$0xf] %vm706_vm2, %v930_v63 }
  0xf9   : > { %v606_v1 = vadd.f32 %v605_v38, %v511_v61  ;;  %v965_v2 = vpop.f32.mrb[10].mxu0  ;;  %v665_v30 = vsel %vm620_vm3, %v651_v21, 0.0 }
  0xfa   : > { %v656_v3 = vadd.f32 %v655_v58, %v654_v60  ;;  %v627_v4 = vadd.f32 %v626_v62, %v625_v59  ;;  %v514_v5 = vpop.f32.mrb[11].mxu0  ;;  %v929_v7 = vpack.c.bf16 %v614_v0, %v614_v0  ;;  %v650_v14 = vmul.f32 %v614_v0, %v614_v0 }
  0xfb   : > { %v628_v8 = vsel %vm620_vm3, %v606_v1, 0.0  ;;  %v648_v10 = vmul.f32 %v606_v1, %v606_v1  ;;  %v927_v12 = vpack.c.bf16 %v606_v1, %v606_v1  ;;  %v609_v13 = vadd.f32 %v608_v46, %v514_v5 }
  0xfc   : > { %v629_v9 = vadd.f32 %v628_v8, %v627_v4  ;;  %v658_v11 = vadd.f32 %v657_v6, %v656_v3  ;;  %713 = vst.msk [vmem:[%s1131_s16 + $0x18] sm:$0xf] %vm706_vm2, %v929_v7  ;;  %v632_v22 = vsel %vm620_vm3, %v614_v0, 0.0  ;;  %v663_v27 = vsel %vm620_vm3, %v650_v14, 0.0 }
  0xfd   : > { %v659_v15 = vsel %vm620_vm3, %v648_v10, 0.0  ;;  %711 = vst.msk [vmem:[%s1131_s16 + $0x10] sm:$0xf] %vm706_vm2, %v927_v12  ;;  %v630_v17 = vsel %vm620_vm3, %v609_v13, 0.0  ;;  %v649_v18 = vmul.f32 %v609_v13, %v609_v13  ;;  %v928_v19 = vpack.c.bf16 %v609_v13, %v609_v13 }
  0xfe   : > { %v660_v16 = vadd.f32 %v659_v15, %v658_v11  ;;  %v631_v20 = vadd.f32 %v630_v17, %v629_v9 }
  0xff   : > { %v661_v23 = vsel %vm620_vm3, %v649_v18, 0.0  ;;  %712 = vst.msk [vmem:[%s1131_s16 + $0x14] sm:$0xf] %vm706_vm2, %v928_v19 }
 0x100   : > { %v633_v24 = vadd.f32 %v632_v22, %v631_v20  ;;  %v662_v25 = vadd.f32 %v661_v23, %v660_v16 }
 0x102   : > { %v635_v28 = vadd.f32 %v634_v26, %v633_v24  ;;  %v664_v29 = vadd.f32 %v663_v27, %v662_v25 }
 0x104   : > { %v636_v31 = vrot.slane %v635_v28, 4  ;;  %v666_v32 = vadd.f32 %v665_v30, %v664_v29 }
 0x106   : > { %v637_v33 = vadd.f32 %v636_v31, %v635_v28  ;;  %v667_v34 = vrot.slane %v666_v32, 4 }
 0x108   : > { %v638_v35 = vrot.slane %v637_v33, 2  ;;  %v668_v36 = vadd.f32 %v667_v34, %v666_v32 }
 0x10a   : > { %v639_v37 = vadd.f32 %v638_v35, %v637_v33  ;;  %v669_v38 = vrot.slane %v668_v36, 2 }
 0x10c   : > { %v640_v39 = vrot.slane %v639_v37, 1  ;;  %v670_v40 = vadd.f32 %v669_v38, %v668_v36 }
 0x10e   : > { %v641_v41 = vadd.f32 %v640_v39, %v639_v37  ;;  %v671_v42 = vrot.slane %v670_v40, 1 }
 0x110   : > { %643 = vst.msk [vmem:[%s349_s23] sm:$0x1] %vm642_vm4, %v641_v41  ;;  %v672_v43 = vadd.f32 %v671_v42, %v670_v40 }
 0x112   : > { %673 = vst.msk [vmem:[%s354_s26] sm:$0x1] %vm642_vm4, %v672_v43 }
 0x113 PF: > { %s16_s20 = sadd.s32 1, %s1045_s20   ;;  %s1188_s18 = smov %s1041_s19 }
 0x114   : > { %p13_p5 = scmp.ge.s32.totalorder %s16_s20, 4   ;;  %s1189_s19 = smov %s1191_s21 }
 0x116   :  { %15 = sbr.rel (!%p13_p5) target bundleno = 2 (0x2), region = 90 }

</bundles_post_ra>
